<compile_context>
chip_gen: v7x
topology: tpu7x:2x2x1
jax: 0.10.0
libtpu: 0.0.40
codegen_flags: <defaults>
</compile_context>

<pallas_src>
import functools
import math

import jax
import jax.numpy as jnp
from jax.experimental import pallas as pl
from jax.experimental.pallas import tpu as pltpu


def _make_fused_affine_kernel(compute_dtype):
    def kernel(x_ref, w_ref, b_ref, o_ref):
        # x_ref: (tm, K) in x's native dtype; cast in-kernel (free VPU op)
        # w_ref: (K, N) in compute dtype; b_ref: (1, N) f32; o_ref: (tm, N)
        x = x_ref[...].astype(compute_dtype)
        acc = jnp.dot(x, w_ref[...], preferred_element_type=jnp.float32)
        o_ref[...] = (acc + b_ref[...]).astype(o_ref.dtype)

    return kernel


def _dense_pack(d):
    # smallest power-of-two pack making pack*d a multiple of 128
    return 128 // math.gcd(d, 128)


def byte_combine(x, w1, b1, w2, b2, *, compute_dtype=None, out_dtype=None,
                 max_tm=4096):
    """ByteCombine forward: dense2(dense1(x)).

    x:  (..., d_in)
    w1: (d_in, d_inner)   b1: (d_inner,)   (weights stored transposed vs torch)
    w2: (d_inner, d_out)  b2: (d_out,)
    Returns (..., d_out) in out_dtype (default: x.dtype).
    """
    *lead, d_in = x.shape
    d_out = w2.shape[1]
    out_dt = jnp.dtype(out_dtype) if out_dtype is not None else jnp.dtype(x.dtype)
    cdt = jnp.dtype(compute_dtype) if compute_dtype is not None else jnp.dtype(x.dtype)

    f32 = jnp.float32
    hi = jax.lax.Precision.HIGHEST
    # Affine fusion -- valid because ByteCombine has no activation between layers.
    w_f = jnp.dot(w1.astype(f32), w2.astype(f32), precision=hi)            # (d_in, d_out)
    b_f = jnp.dot(b1.astype(f32), w2.astype(f32), precision=hi) + b2.astype(f32)

    x2d = x.reshape(-1, d_in)
    m = x2d.shape[0]
    if m == 0:
        return jnp.zeros((*lead, d_out), dtype=out_dt)

    # ---- lane packing (no padding / no HBM copy of x) -----------------------
    w_b = jnp.dtype(cdt).itemsize
    pack_out = _dense_pack(d_out)
    pack_in = _dense_pack(d_in)
    pack = (pack_out * pack_in) // math.gcd(pack_out, pack_in)   # lcm (power of 2)
    # keep the block-diagonal packed weight modest
    while pack > 1 and (pack * d_in) * (pack * d_out) * w_b > (8 << 20):
        pack //= 2
    # only packs that divide m exactly => reshape is a free bitcast, never jnp.pad
    while pack > 1 and m % pack != 0:
        pack //= 2

    rows = m // pack
    k_dim = pack * d_in
    n_dim = pack * d_out
    xp = x2d.reshape(rows, k_dim)                    # free (pack | m)

    if pack > 1:
        w_k = jnp.kron(jnp.eye(pack, dtype=f32), w_f)   # block-diagonal (K, N)
        b_k = jnp.tile(b_f, pack)                        # (N,)
    else:
        w_k, b_k = w_f, b_f
    w_k = w_k.astype(cdt)                            # tiny, fine to cast in wrapper
    b_k = b_k.reshape(1, n_dim).astype(f32)

    # ---- generation-aware VMEM budget & row tiling ---------------------------
    try:
        vmem_cap = int(getattr(pltpu.get_tpu_info(), "vmem_capacity_bytes", 0)) \
            or (64 << 20)
    except Exception:
        vmem_cap = 64 << 20
    vmem_budget = (vmem_cap * 3) // 4                # headroom for compiler scratch

    in_b = jnp.dtype(x.dtype).itemsize
    out_b = jnp.dtype(out_dt).itemsize
    resident = 2 * (k_dim * n_dim * w_b + n_dim * 4)   # weight + bias (double-buffered)
    per_row = 2 * (k_dim * in_b + n_dim * out_b)       # double-buffered x / out tiles
    slack = 2 << 20
    tm_cap = max(8, ((vmem_budget - resident - slack) // per_row // 8) * 8)
    tm_cap = min(tm_cap, max_tm)

    MIN_SPLIT_ROWS = 512
    if rows <= min(MIN_SPLIT_ROWS, tm_cap):
        tm = rows                                    # single block, full-dim spec
    else:
        # >= 4 blocks so "parallel" shards across TensorCores and DMA overlaps compute
        tm = max(8, min(tm_cap, (pl.cdiv(rows, 4) // 8) * 8))
    grid = pl.cdiv(rows, tm)

    need = tm * per_row + resident + slack
    vmem_limit = int(min(vmem_budget, max(need, 32 << 20)))

    out = pl.pallas_call(
        _make_fused_affine_kernel(cdt),
        out_shape=jax.ShapeDtypeStruct((rows, n_dim), out_dt),
        grid_spec=pltpu.PrefetchScalarGridSpec(
            num_scalar_prefetch=0,
            grid=(grid,),
            in_specs=[
                pl.BlockSpec((tm, k_dim), lambda i: (i, 0)),      # x row tile
                pl.BlockSpec((k_dim, n_dim), lambda i: (0, 0)),   # fused W (resident)
                pl.BlockSpec((1, n_dim), lambda i: (0, 0)),       # fused bias (f32)
            ],
            out_specs=pl.BlockSpec((tm, n_dim), lambda i: (i, 0)),
        ),
        compiler_params=pltpu.CompilerParams(
            dimension_semantics=("parallel",),
            vmem_limit_bytes=vmem_limit,
        ),
    )(xp, w_k, b_k)

    # (rows, pack*d_out) -> (m, d_out) is a free bitcast; no slicing needed.
    return out.reshape(m, d_out).reshape(*lead, d_out)


if __name__ == "__main__":
    # ByteCombine(input_dim=32, output_dim=64, inner_dim=128) on
    # x of shape (batch=2, seq=8, input_dim=32).
    input_dim, inner_dim, output_dim = 32, 128, 64
    batch, seq = 2, 8

    key = jax.random.PRNGKey(0)
    kx, kw1, kb1, kw2, kb2 = jax.random.split(key, 5)

    x = jax.random.normal(kx, (batch, seq, input_dim), dtype=jnp.float32)
    # Deterministic synthetic parameters (stored as (in, out), i.e. W^T).
    w1 = jax.random.normal(kw1, (input_dim, inner_dim), dtype=jnp.float32) * 0.05
    b1 = jax.random.normal(kb1, (inner_dim,), dtype=jnp.float32) * 0.05
    w2 = jax.random.normal(kw2, (inner_dim, output_dim), dtype=jnp.float32) * 0.05
    b2 = jax.random.normal(kb2, (output_dim,), dtype=jnp.float32) * 0.05

    ref = (x @ w1 + b1) @ w2 + b2

    # f32 path (pack=4, single block).
    y = jax.block_until_ready(byte_combine(x, w1, b1, w2, b2))
    assert y.shape == (batch, seq, output_dim)
    assert jnp.allclose(y, ref, atol=2e-3, rtol=2e-3), "f32 mismatch vs reference"

    # bf16 compute path: x stays f32 in HBM, cast in-kernel; f32 accumulation.
    y_bf16 = jax.block_until_ready(
        byte_combine(x, w1, b1, w2, b2, compute_dtype=jnp.bfloat16))
    assert y_bf16.shape == (batch, seq, output_dim)
    assert jnp.allclose(y_bf16, ref, atol=5e-2, rtol=5e-2), "bf16 mismatch vs reference"

    # bf16 output path (halves output write traffic).
    y_o16 = jax.block_until_ready(
        byte_combine(x, w1, b1, w2, b2, compute_dtype=jnp.bfloat16,
                     out_dtype=jnp.bfloat16))
    assert y_o16.dtype == jnp.bfloat16
    assert jnp.allclose(y_o16.astype(jnp.float32), ref, atol=1e-1, rtol=1e-1), \
        "bf16-out mismatch vs reference"

    # Ragged leading dims: M=21 is odd -> pack falls back to 1, no padding anywhere.
    x2 = jax.random.normal(kx, (3, 7, input_dim), dtype=jnp.float32)
    ref2 = (x2 @ w1 + b1) @ w2 + b2
    y2 = jax.block_until_ready(byte_combine(x2, w1, b1, w2, b2))
    assert y2.shape == (3, 7, output_dim)
    assert jnp.allclose(y2, ref2, atol=2e-3, rtol=2e-3), "ragged mismatch vs reference"

    # Larger M exercising the multi-block grid with a ragged last block
    # (rows=750 -> tm=184, grid=5, partial final block handled by Pallas masking).
    x3 = jax.random.normal(kx, (1, 3000, input_dim), dtype=jnp.float32)
    ref3 = (x3 @ w1 + b1) @ w2 + b2
    y3 = jax.block_until_ready(byte_combine(x3, w1, b1, w2, b2))
    assert y3.shape == (1, 3000, output_dim)
    assert jnp.allclose(y3, ref3, atol=2e-3, rtol=2e-3), "multi-block mismatch vs reference"

    print("KERNEL_OK")
</pallas_src>

<mosaic_0001>
module attributes {stable_mosaic.version = 11 : i64} {
  func.func @kernel(%arg0: i32, %arg1: memref<4x128xf32, #tpu.memory_space<vmem>>, %arg2: memref<128x256xf32, #tpu.memory_space<vmem>>, %arg3: memref<1x256xf32, #tpu.memory_space<vmem>>, %arg4: memref<4x256xf32, #tpu.memory_space<vmem>>) attributes {dimension_semantics = [#tpu.dimension_semantics<parallel>], iteration_bounds = array<i64: 1>, scalar_prefetch = 0 : i64, scratch_operands = 0 : i64, tpu.core_type = #tpu.core_type<tc>, window_params = [{transform_indices = @transform_0, window_bounds = array<i64: 4, 128>}, {pipeline_mode = #tpu.pipeline_mode<synchronous>, transform_indices = @transform_1, window_bounds = array<i64: 128, 256>}, {pipeline_mode = #tpu.pipeline_mode<synchronous>, transform_indices = @transform_2, window_bounds = array<i64: 1, 256>}, {transform_indices = @transform_3, window_bounds = array<i64: 4, 256>}]} {
    %c0 = arith.constant 0 : index
    %c0_0 = arith.constant 0 : index
    %0 = vector.load %arg1[%c0, %c0_0] : memref<4x128xf32, #tpu.memory_space<vmem>>, vector<4x128xf32>
    %c0_1 = arith.constant 0 : index
    %c0_2 = arith.constant 0 : index
    %1 = vector.load %arg2[%c0_1, %c0_2] : memref<128x256xf32, #tpu.memory_space<vmem>>, vector<128x256xf32>
    %cst = arith.constant dense<0.000000e+00> : vector<4x256xf32>
    %2 = tpu.matmul %0, %1, %cst {dimension_numbers = #tpu.dot_dimension_numbers<[1], [0], [0], [1], [0, 0, 1, 1], [], []>} : vector<4x128xf32>, vector<128x256xf32>, vector<4x256xf32> -> vector<4x256xf32>
    %c0_3 = arith.constant 0 : index
    %c0_4 = arith.constant 0 : index
    %3 = vector.load %arg3[%c0_3, %c0_4] : memref<1x256xf32, #tpu.memory_space<vmem>>, vector<1x256xf32>
    %4 = vector.broadcast %3 : vector<1x256xf32> to vector<4x256xf32>
    %5 = arith.addf %2, %4 : vector<4x256xf32>
    %c0_5 = arith.constant 0 : index
    %c0_6 = arith.constant 0 : index
    %6 = vector.load %arg4[%c0_5, %c0_6] : memref<4x256xf32, #tpu.memory_space<vmem>>, vector<4x256xf32>
    tpu.vector_store %arg4[%c0_5, %c0_6], %5 {strides = array<i32>} : memref<4x256xf32, #tpu.memory_space<vmem>>, vector<4x256xf32>,
    return
  }
  func.func @transform_0(%arg0: i32) -> (i32, i32) {
    %c0_i32 = arith.constant 0 : i32
    %c0_i32_0 = arith.constant 0 : i32
    return %arg0, %c0_i32 : i32, i32
  }
  func.func @transform_1(%arg0: i32) -> (i32, i32) {
    %c0_i32 = arith.constant 0 : i32
    %c0_i32_0 = arith.constant 0 : i32
    %c0_i32_1 = arith.constant 0 : i32
    return %c0_i32, %c0_i32_0 : i32, i32
  }
  func.func @transform_2(%arg0: i32) -> (i32, i32) {
    %c0_i32 = arith.constant 0 : i32
    %c0_i32_0 = arith.constant 0 : i32
    %c0_i32_1 = arith.constant 0 : i32
    return %c0_i32, %c0_i32_0 : i32, i32
  }
  func.func @transform_3(%arg0: i32) -> (i32, i32) {
    %c0_i32 = arith.constant 0 : i32
    %c0_i32_0 = arith.constant 0 : i32
    return %arg0, %c0_i32 : i32, i32
  }
}

</mosaic_0001>

<bundles_post_ra>
// kernel: tpu_custom_call.1
= control target key start
LH: loop header
LB: loop body
LE: loop exit
PB: predicated region body
PF: predicated region fallthrough
CT: control target
= control target key end

     0   :  { %8 = vsyncpa [#allocation3], 0  ;;  %s360_s0 = inlined_call_operand.hbm [shape: f32[4,128], index: 0, kind: input, shape index: {}]   ;;  %s361_s1 = inlined_call_operand.hbm [shape: f32[128,256], index: 1, kind: input, shape index: {}]   ;;  %s362_s2 = inlined_call_operand.vmem [shape: f32[1,256], index: 2, kind: input, shape index: {}]   ;;  %s363_s3 = inlined_call_operand.hbm [shape: f32[4,256], index: 3, kind: output, shape index: {}]  }
   0x1   :  { %9 = vsyncpa [#allocation6], 0 }
   0x2   :  { %10 = vsyncpa [#allocation4], 0  ;;  %s288_s12 = smov [#allocation2]   ;;  %s289_s14 = smov [#allocation5]  }
   0x3   :  { %s17_s13 = sshll.u32 %s288_s12, 4  ;;  %s26_s15 = sshll.u32 %s289_s14, 4  ;;  %s18_s13 = int_to_ptr.vmem [resolvable:$true] %s17_s13  ;;  %s314_s15 = int_to_ptr.vmem [resolvable:$true] %s26_s15 }
   0x4   :  { %s216_s18 = scalar_lea.hbm %s360_s0, 64 }
   0x5   :  { %p217_p0 = scmp.ne.s32.totalorder %s360_s0, %s216_s18  ;;  %p220_p1 = scmp.lt.u32.totalorder %s216_s18, %s360_s0 }
   0x7   :  { %p222_p2 = pnand %p220_p1, %p217_p0 }
   0x9   :  { %225 = shalt.err (!%p222_p2)
}
   0xa   :  { %s226_s23 = scalar_lea.vmem %s18_s13, 64  ;;  %p231_p4 = scmp.lt.s32.totalorder %s18_s13, %s18_s13 }
   0xb   :  { %p227_p3 = scmp.ne.s32.totalorder %s18_s13, %s226_s23  ;;  %p232_p5 = scmp.lt.s32.totalorder %s226_s23, %s226_s23 }
   0xd   :  { %p233_p6 = por %p232_p5, %p231_p4 }
   0xf   :  { %p234_p7 = pnand %p233_p6, %p227_p3 }
  0x11   :  { %237 = shalt.err (!%p234_p7)
}
  0x12   :  { %20 = dma.hbm_to_vmem [thread:$0]  %s360_s0, 64, %s18_s13, [#allocation3]  }
  0x13   :  { %s238_s28 = scalar_lea.hbm %s361_s1, 4096 }
  0x14   :  { %p239_p8 = scmp.ne.s32.totalorder %s361_s1, %s238_s28  ;;  %p242_p9 = scmp.lt.u32.totalorder %s238_s28, %s361_s1 }
  0x16   :  { %p244_p10 = pnand %p242_p9, %p239_p8 }
  0x18   :  { %247 = shalt.err (!%p244_p10)
}
  0x19   :  { %s248_s6 = scalar_lea.vmem %s314_s15, 4096  ;;  %p253_p12 = scmp.lt.s32.totalorder %s314_s15, %s314_s15 }
  0x1a   :  { %p249_p11 = scmp.ne.s32.totalorder %s314_s15, %s248_s6  ;;  %p254_p13 = scmp.lt.s32.totalorder %s248_s6, %s248_s6 }
  0x1c   :  { %p255_p0 = por %p254_p13, %p253_p12 }
  0x1e   :  { %p256_p1 = pnand %p255_p0, %p249_p11 }
  0x20   :  { %259 = shalt.err (!%p256_p1)
}
  0x21   :  { %s290_s0 = smov 256   ;;  %s291_s7 = smov 16  }
  0x22   :  { %32 = dma.hbm_to_vmem [thread:$0]  %s361_s1, 4096, %s314_s15, [#allocation6], %s290_s0, %s290_s0, %s291_s7  }
  0x23   :  { %282 = dma.done.wait [#allocation3], 64  }
  0x24   :  { %283 = vsyncadd [#allocation3], 4294967232 }
  0x25   :  { %284 = dma.done.wait [#allocation6], 4096  }
  0x26   :  { %285 = vsyncadd [#allocation6], 4294963200  ;;  %v292_v0 = vmov 0.0   ;;  %v43_v1 = vld [vmem:[#allocation5 + $0x8] sm:$0xff]  ;;  %v45_v2 = vld [vmem:[#allocation5 + $0x18] sm:$0xff]  ;;  %v76_v50 = vlaneseq  ;;  %s293_s11 = smov [#allocation7]  }
  0x27   :  { %150 = vmatprep.mubr.f32.mxu0 %v292_v0  ;;  %v42_v3 = vld [vmem:[#allocation5] sm:$0xff]  ;;  %v178_v4 = vpack.c.bf16 %v45_v2, %v43_v1  ;;  %v44_v5 = vld [vmem:[#allocation5 + $0x10] sm:$0xff]  ;;  %v47_v6 = vld [vmem:[#allocation5 + $0x28] sm:$0xff]  ;;  %s168_s12 = sshll.u32 %s293_s11, 4  ;;  %s169_s12 = int_to_ptr.vmem [resolvable:$true] %s168_s12 }
  0x28   :  { %v49_v7 = vld [vmem:[#allocation5 + $0x38] sm:$0xff]  ;;  %v180_v8 = vpack.c.bf16 %v44_v5, %v42_v3  ;;  %v46_v10 = vld [vmem:[#allocation5 + $0x20] sm:$0xff]  ;;  %v48_v11 = vld [vmem:[#allocation5 + $0x30] sm:$0xff]  ;;  %v77_v51 = vshrl.u32 %v76_v50, 7  ;;  %s260_s13 = scalar_lea.vmem %s169_s12, 128  ;;  %p265_p3 = scmp.lt.s32.totalorder %s169_s12, %s169_s12 }
  0x29   :  { %v182_v9 = vpack.c.bf16 %v49_v7, %v47_v6  ;;  %v51_v12 = vld [vmem:[#allocation5 + $0x48] sm:$0xff]  ;;  %179 = vmatprep.subr.bf16.mxu0 %v178_v4  ;;  %v53_v13 = vld [vmem:[#allocation5 + $0x58] sm:$0xff]  ;;  %v184_v14 = vpack.c.bf16 %v48_v11, %v46_v10  ;;  %v50_v16 = vld [vmem:[#allocation5 + $0x40] sm:$0xff]  ;;  %p261_p2 = scmp.ne.s32.totalorder %s169_s12, %s260_s13  ;;  %p266_p4 = scmp.lt.s32.totalorder %s260_s13, %s260_s13 }
  0x2a   :  { %181 = vmatpush1.bf16.msra.mxu0 %v180_v8  ;;  %v186_v15 = vpack.c.bf16 %v53_v13, %v51_v12  ;;  %v52_v17 = vld [vmem:[#allocation5 + $0x50] sm:$0xff]  ;;  %v55_v18 = vld [vmem:[#allocation5 + $0x68] sm:$0xff]  ;;  %v57_v19 = vld [vmem:[#allocation5 + $0x78] sm:$0xff]  ;;  %v78_v52 = vsub.s32 0, %v77_v51  ;;  %v82_v54 = vsub.s32 1, %v77_v51 }
  0x2b   :  { %183 = vmatprep.subr.bf16.mxu0 %v182_v9  ;;  %v188_v20 = vpack.c.bf16 %v52_v17, %v50_v16  ;;  %v190_v21 = vpack.c.bf16 %v57_v19, %v55_v18  ;;  %v54_v22 = vld [vmem:[#allocation5 + $0x60] sm:$0xff]  ;;  %v56_v23 = vld [vmem:[#allocation5 + $0x70] sm:$0xff]  ;;  %v59_v24 = vld [vmem:[#allocation5 + $0x88] sm:$0xff]  ;;  %p267_p5 = por %p266_p4, %p265_p3 }
  0x2c   :  { %v61_v25 = vld [vmem:[#allocation5 + $0x98] sm:$0xff]  ;;  %v192_v26 = vpack.c.bf16 %v56_v23, %v54_v22  ;;  %v58_v28 = vld [vmem:[#allocation5 + $0x80] sm:$0xff]  ;;  %v60_v29 = vld [vmem:[#allocation5 + $0x90] sm:$0xff] }
  0x2d   :  { %v194_v27 = vpack.c.bf16 %v61_v25, %v59_v24  ;;  %v63_v30 = vld [vmem:[#allocation5 + $0xa8] sm:$0xff]  ;;  %v65_v31 = vld [vmem:[#allocation5 + $0xb8] sm:$0xff]  ;;  %v196_v32 = vpack.c.bf16 %v60_v29, %v58_v28  ;;  %v62_v34 = vld [vmem:[#allocation5 + $0xa0] sm:$0xff]  ;;  %p268_p6 = pnand %p267_p5, %p261_p2 }
  0x2e   :  { %185 = vmatpush1.bf16.msra.mxu0 %v184_v14  ;;  %v198_v33 = vpack.c.bf16 %v65_v31, %v63_v30  ;;  %v64_v35 = vld [vmem:[#allocation5 + $0xb0] sm:$0xff]  ;;  %v67_v36 = vld [vmem:[#allocation5 + $0xc8] sm:$0xff]  ;;  %v69_v37 = vld [vmem:[#allocation5 + $0xd8] sm:$0xff] }
  0x2f   :  { %187 = vmatprep.subr.bf16.mxu0 %v186_v15  ;;  %v200_v38 = vpack.c.bf16 %v64_v35, %v62_v34  ;;  %v202_v39 = vpack.c.bf16 %v69_v37, %v67_v36  ;;  %v66_v40 = vld [vmem:[#allocation5 + $0xc0] sm:$0xff]  ;;  %v68_v41 = vld [vmem:[#allocation5 + $0xd0] sm:$0xff]  ;;  %v71_v42 = vld [vmem:[#allocation5 + $0xe8] sm:$0xff] }
  0x30   :  { %v73_v43 = vld [vmem:[#allocation5 + $0xf8] sm:$0xff]  ;;  %v204_v44 = vpack.c.bf16 %v68_v41, %v66_v40  ;;  %v70_v46 = vld [vmem:[#allocation5 + $0xe0] sm:$0xff]  ;;  %v72_v47 = vld [vmem:[#allocation5 + $0xf0] sm:$0xff] }
  0x31   :  { %v206_v45 = vpack.c.bf16 %v73_v43, %v71_v42  ;;  %v208_v48 = vpack.c.bf16 %v72_v47, %v70_v46  ;;  %v41_v49 = vld [vmem:[#allocation2] sm:$0xf] }
  0x32   :  { %189 = vmatpush1.bf16.msra.mxu0 %v188_v20  ;;  %v74_v53 = vld [vmem:[%s362_s2] sm:$0x3] }
  0x33   :  { %191 = vmatprep.subr.bf16.mxu0 %v190_v21  ;;  %v79_v55 = vrot.slane %v74_v53, %v78_v52  ;;  %v83_v56 = vrot.slane %v74_v53, %v82_v54 }
  0x36   :  { %193 = vmatpush1.bf16.msra.mxu0 %v192_v26 }
  0x37   :  { %195 = vmatprep.subr.bf16.mxu0 %v194_v27 }
  0x3a   :  { %197 = vmatpush1.bf16.msra.mxu0 %v196_v32 }
  0x3b   :  { %199 = vmatprep.subr.bf16.mxu0 %v198_v33 }
  0x3e   :  { %201 = vmatpush1.bf16.msra.mxu0 %v200_v38 }
  0x3f   :  { %203 = vmatprep.subr.bf16.mxu0 %v202_v39 }
  0x42   :  { %205 = vmatpush1.bf16.msra.mxu0 %v204_v44 }
  0x43   :  { %207 = vmatprep.subr.bf16.mxu0 %v206_v45 }
  0x46   :  { %209 = vmatpush1.bf16.msra.mxu0 %v208_v48 }
  0x49   :  { %151 = vmatmul.mubr.f32.vlgmr.msra.gmra.mrb[0].mxu0 %v41_v49 }
 0x11c   :  { %v152_v57 = vpop.f32.mrb[0].mxu0 }
 0x11d   :  { %v153_v58 = vadd.f32 %v152_v57, %v79_v55  ;;  %v154_v59 = vpop.f32.mrb[1].mxu0 }
 0x11e   :  { %v155_v60 = vadd.f32 %v154_v59, %v83_v56 }
 0x120   :  { %v159_v61 = vcombine.low %v153_v58, %v155_v60 }
 0x122   :  { %161 = vst [vmem:[#allocation7] sm:$0xff] %v159_v61 }
 0x123   :  { %271 = shalt.err (!%p268_p6)
}
 0x124   :  { %s272_s15 = scalar_lea.hbm %s363_s3, 128 }
 0x125   :  { %p273_p7 = scmp.ne.s32.totalorder %s363_s3, %s272_s15  ;;  %p276_p8 = scmp.lt.u32.totalorder %s272_s15, %s363_s3 }
 0x127   :  { %p278_p9 = pnand %p276_p8, %p273_p7 }
 0x129   :  { %281 = shalt.err (!%p278_p9)
}
 0x12a   :  { %171 = dma.vmem_to_hbm [thread:$0]  %s169_s12, 128, %s363_s3, [#allocation4]  }
 0x12b   :  { %286 = dma.done.wait [#allocation4], 128  }
 0x12c   :  { %287 = vsyncadd [#allocation4], 4294967168 }
 0x12d   :  { %175 = vsyncpa [#allocation3], 1 }
 0x12e   :  { %176 = vsyncpa [#allocation6], 1 }
 0x12f   :  { %177 = vsyncpa [#allocation4], 1 }

</bundles_post_ra>
